<compile_context>
chip_gen: v7x
topology: tpu7x:2x2x1
jax: 0.10.0
libtpu: 0.0.40
codegen_flags: <defaults>
</compile_context>

<pallas_src>
import functools

import jax
import jax.numpy as jnp
from jax import lax
from jax.experimental import pallas as pl
from jax.experimental.pallas import tpu as pltpu


_VMEM_TILE_BUDGET = 40 * 1024 * 1024   # target for tile sizing
_VMEM_LIMIT_CAP = 48 * 1024 * 1024     # < v7x 64 MiB physical, leaves headroom


def _round_up(x, m):
    return (x + m - 1) // m * m


def _vmem_bytes(b_blk, c_pad, t_o, t_hw, x_bytes, out_bytes, w_buffers):
    """Estimate scoped VMEM for one pipelined step."""
    x_tile = 2 * b_blk * c_pad * t_hw * x_bytes       # double-buffered input
    o_tile = 2 * b_blk * t_o * t_hw * out_bytes       # double-buffered output
    w_tile = w_buffers * t_o * c_pad * 2              # bf16 weights
    # in-kernel temporaries: f32 accumulator + f32 upcast of one image + inv
    tmp = t_o * t_hw * 4 + c_pad * t_hw * 4 + t_hw * 4
    return x_tile + o_tile + w_tile + tmp


def _pick_t_hw(hw_128, b_blk, c_pad, t_o, x_bytes, out_bytes, w_buffers, budget):
    """Largest 128-multiple lane tile fitting the VMEM budget, minimizing
    HW padding waste (ties broken toward the larger tile)."""
    best_key, best_t = None, 128
    t = 128
    while t <= min(hw_128, 4096):
        if _vmem_bytes(b_blk, c_pad, t_o, t, x_bytes, out_bytes, w_buffers) <= budget:
            waste = (-hw_128) % t
            key = (waste, -t)
            if best_key is None or key < best_key:
                best_key, best_t = key, t
        t += 128
    return best_t


def _make_conv1o1_kernel(do_norm, b_blk):
    def kernel(x_ref, w_ref, o_ref):
        # x_ref: (b_blk, c_pad, t_hw) bf16
        # w_ref: (t_o, c_pad)        bf16 (VMEM-resident when O fits one tile)
        # o_ref: (b_blk, t_o, t_hw)  out dtype
        w = w_ref[...]                               # hoisted: read once
        for b in range(b_blk):                       # small, statically unrolled
            xb = x_ref[b]                            # (c_pad, t_hw) bf16
            # 1x1 conv == per-pixel matmul on the MXU, f32 accumulation.
            acc = jnp.dot(w, xb, preferred_element_type=jnp.float32)
            if do_norm:
                # L2 norm over channels in f32, folded post-matmul (commutes
                # with the channel contraction). No eps -> matches PyTorch
                # x / torch.norm(x) (all-zero pixel => inf/NaN). Padded HW
                # lanes may go NaN and are sliced off by the wrapper.
                xf = xb.astype(jnp.float32)
                inv = lax.rsqrt(jnp.sum(xf * xf, axis=0, keepdims=True))
                acc = acc * inv
            o_ref[b] = acc.astype(o_ref.dtype)

    return kernel


@functools.partial(jax.jit, static_argnames=("norm",))
def conv1o1_layer(x, weight, norm=True):
    """x: (N, C, H, W), weight: (O, C, 1, 1). Returns (N, O, H, W)."""
    N, C, H, W = x.shape
    O = weight.shape[0]
    HW = H * W
    out_dtype = x.dtype

    c_pad = _round_up(C, 8)
    o_pad = _round_up(O, 8)

    # Tile O only when the filter count is large enough to threaten VMEM.
    if o_pad > 1024:
        t_o = 512
        o_pad = _round_up(o_pad, t_o)
    else:
        t_o = o_pad
    num_o = o_pad // t_o

    hw_128 = _round_up(HW, 128)

    # Batch images per grid step for tiny spatial extents to amortize the
    # ~0.35 us/step overhead + short DMAs (but keep >= 2 grid steps).
    b_blk = 1
    if hw_128 <= 512:
        for cand in (8, 4, 2):
            if N % cand == 0 and N // cand >= 2:
                b_blk = cand
                break

    x_bytes = 2                                      # bf16 input stream
    out_bytes = jnp.dtype(out_dtype).itemsize
    w_buffers = 1 if num_o == 1 else 2               # constant map -> single buffer

    t_hw = _pick_t_hw(hw_128, b_blk, c_pad, t_o, x_bytes, out_bytes,
                      w_buffers, _VMEM_TILE_BUDGET)
    hw_pad = _round_up(HW, t_hw)

    vmem_need = _vmem_bytes(b_blk, c_pad, t_o, t_hw, x_bytes, out_bytes, w_buffers)
    vmem_limit = int(min(_VMEM_LIMIT_CAP, max(vmem_need + (8 << 20), 24 << 20)))

    # bf16 operands produced here (halves kernel-side HBM reads); padding is
    # skipped entirely when shapes are already aligned, so no extra
    # full-tensor passes are paid in the common case.
    x_flat = x.reshape(N, C, HW).astype(jnp.bfloat16)
    if (c_pad, hw_pad) != (C, HW):
        x_flat = jnp.pad(x_flat, ((0, 0), (0, c_pad - C), (0, hw_pad - HW)))
    w2d = weight.reshape(weight.shape[0], -1).astype(jnp.bfloat16)
    if (o_pad, c_pad) != (O, C):
        w2d = jnp.pad(w2d, ((0, o_pad - O), (0, c_pad - C)))

    grid = (N // b_blk, num_o, hw_pad // t_hw)

    out_flat = pl.pallas_call(
        _make_conv1o1_kernel(norm, b_blk),
        out_shape=jax.ShapeDtypeStruct((N, o_pad, hw_pad), out_dtype),
        grid_spec=pltpu.PrefetchScalarGridSpec(
            num_scalar_prefetch=0,
            grid=grid,
            in_specs=[
                # x tile: b_blk images, all channels, one lane-dense HW block.
                pl.BlockSpec((b_blk, c_pad, t_hw), lambda b, j, s: (b, 0, s)),
                # weight tile: constant index map when num_o == 1 (stays
                # VMEM-resident); single-buffered in that case.
                pl.BlockSpec((t_o, c_pad), lambda b, j, s: (j, 0),
                             pipeline_mode=pl.Buffered(w_buffers)),
            ],
            out_specs=pl.BlockSpec((b_blk, t_o, t_hw),
                                   lambda b, j, s: (b, j, s)),
        ),
        compiler_params=pltpu.CompilerParams(
            dimension_semantics=("parallel", "parallel", "parallel"),
            vmem_limit_bytes=vmem_limit,
        ),
    )(x_flat, w2d)

    if (o_pad, hw_pad) != (O, HW):
        out_flat = out_flat[:, :O, :HW]
    return out_flat.reshape(N, O, H, W)


def conv1o1_reference(x, weight, norm=True):
    """Plain-JAX f32 reference mirroring the PyTorch forward."""
    if norm:
        n = jnp.sqrt(jnp.sum(x * x, axis=1, keepdims=True))
        x = x / n
    w2d = weight.reshape(weight.shape[0], -1)
    return jnp.einsum("nchw,oc->nohw", x, w2d)


if __name__ == "__main__":
    key = jax.random.PRNGKey(0)
    kx, kw = jax.random.split(key)

    N, C, H, W = 2, 4, 16, 16
    O = 8  # number of 1x1 filters

    x = jax.random.normal(kx, (N, C, H, W), dtype=jnp.float32)
    weight = jax.random.normal(kw, (O, C, 1, 1), dtype=jnp.float32)

    # norm=True (default path)
    out = jax.block_until_ready(conv1o1_layer(x, weight, norm=True))
    ref = conv1o1_reference(x, weight, norm=True)
    assert out.shape == (N, O, H, W)
    # bf16 MXU operands (and bf16-rounded x feeding the norm) with f32
    # accumulation -> loose tolerance vs pure-f32 reference.
    assert jnp.allclose(out, ref, atol=5e-2, rtol=5e-2), "mismatch (norm=True)"

    # norm=False path
    out_nn = jax.block_until_ready(conv1o1_layer(x, weight, norm=False))
    ref_nn = conv1o1_reference(x, weight, norm=False)
    assert jnp.allclose(out_nn, ref_nn, atol=5e-2, rtol=5e-2), "mismatch (norm=False)"

    print("KERNEL_OK")
</pallas_src>

<mosaic_0001>
module attributes {stable_mosaic.version = 11 : i64} {
  func.func @kernel(%arg0: i32, %arg1: i32, %arg2: i32, %arg3: memref<1x8x256xbf16, #tpu.memory_space<vmem>>, %arg4: memref<8x8xbf16, #tpu.memory_space<vmem>>, %arg5: memref<1x8x256xf32, #tpu.memory_space<vmem>>) attributes {dimension_semantics = [#tpu.dimension_semantics<parallel>, #tpu.dimension_semantics<parallel>, #tpu.dimension_semantics<parallel>], iteration_bounds = array<i64: 2, 1, 1>, scalar_prefetch = 0 : i64, scratch_operands = 0 : i64, tpu.core_type = #tpu.core_type<tc>, window_params = [{transform_indices = @transform_0, window_bounds = array<i64: 1, 8, 256>}, {pipeline_mode = #tpu.pipeline_mode<synchronous>, transform_indices = @transform_1, window_bounds = array<i64: 8, 8>}, {transform_indices = @transform_2, window_bounds = array<i64: 1, 8, 256>}]} {
    %c0 = arith.constant 0 : index
    %c0_0 = arith.constant 0 : index
    %0 = vector.load %arg4[%c0, %c0_0] : memref<8x8xbf16, #tpu.memory_space<vmem>>, vector<8x8xbf16>
    %c0_1 = arith.constant 0 : index
    %c0_2 = arith.constant 0 : index
    %c0_3 = arith.constant 0 : index
    %1 = vector.load %arg3[%c0_1, %c0_2, %c0_3] : memref<1x8x256xbf16, #tpu.memory_space<vmem>>, vector<1x8x256xbf16>
    %2 = vector.shape_cast %1 : vector<1x8x256xbf16> to vector<8x256xbf16>
    %cst = arith.constant dense<0.000000e+00> : vector<8x256xf32>
    %3 = tpu.matmul %0, %2, %cst {dimension_numbers = #tpu.dot_dimension_numbers<[1], [0], [0], [1], [0, 0, 1, 1], [], []>} : vector<8x8xbf16>, vector<8x256xbf16>, vector<8x256xf32> -> vector<8x256xf32>
    %4 = arith.extf %2 : vector<8x256xbf16> to vector<8x256xf32>
    %5 = arith.mulf %4, %4 : vector<8x256xf32>
    %cst_4 = arith.constant dense<0.000000e+00> : vector<256xf32>
    %6 = vector.multi_reduction <add>, %5, %cst_4 [0] : vector<8x256xf32> to vector<256xf32>
    %7 = vector.shape_cast %6 : vector<256xf32> to vector<1x256xf32>
    %8 = math.rsqrt %7 : vector<1x256xf32>
    %9 = vector.broadcast %8 : vector<1x256xf32> to vector<8x256xf32>
    %10 = arith.mulf %3, %9 : vector<8x256xf32>
    %c0_5 = arith.constant 0 : index
    %c0_6 = arith.constant 0 : index
    %c0_7 = arith.constant 0 : index
    %11 = vector.load %arg5[%c0_5, %c0_6, %c0_7] : memref<1x8x256xf32, #tpu.memory_space<vmem>>, vector<1x8x256xf32>
    %12 = vector.shape_cast %11 : vector<1x8x256xf32> to vector<8x256xf32>
    %13 = vector.shape_cast %10 : vector<8x256xf32> to vector<1x8x256xf32>
    tpu.vector_store %arg5[%c0_5, %c0_6, %c0_7], %13 {strides = array<i32>} : memref<1x8x256xf32, #tpu.memory_space<vmem>>, vector<1x8x256xf32>,
    return
  }
  func.func @transform_0(%arg0: i32, %arg1: i32, %arg2: i32) -> (i32, i32, i32) {
    %c0_i32 = arith.constant 0 : i32
    %c0_i32_0 = arith.constant 0 : i32
    return %arg0, %c0_i32, %arg2 : i32, i32, i32
  }
  func.func @transform_1(%arg0: i32, %arg1: i32, %arg2: i32) -> (i32, i32) {
    %c0_i32 = arith.constant 0 : i32
    %c0_i32_0 = arith.constant 0 : i32
    return %arg1, %c0_i32 : i32, i32
  }
  func.func @transform_2(%arg0: i32, %arg1: i32, %arg2: i32) -> (i32, i32, i32) {
    %c0_i32 = arith.constant 0 : i32
    return %arg0, %arg1, %arg2 : i32, i32, i32
  }
}

</mosaic_0001>

<bundles_post_ra>
// kernel: conv1o1_layer.1
= control target key start
LH: loop header
LB: loop body
LE: loop exit
PB: predicated region body
PF: predicated region fallthrough
CT: control target
= control target key end

     0   :  { %s509_s9 = smov 0   ;;  %s511_s10 = smov 0   ;;  %s549_s0 = inlined_call_operand.vmem [shape: bf16[2,8,256], index: 0, kind: input, shape index: {}]   ;;  %s550_s1 = inlined_call_operand.vmem [shape: bf16[8,8], index: 1, kind: input, shape index: {}]   ;;  %s551_s2 = inlined_call_operand.vmem [shape: f32[2,8,256], index: 2, kind: output, shape index: {}]  }
   0x1   :  { %s513_s11 = smov 0  }
   0x2 LB: > { %s31_s12 = sadd.s32 1, %s487_s10  ;;  %p425_p0 = scmp.ge.s32.totalorder %s491_s11, 1  ;;  %s491_s11 = sphi %s513_s11, %s12_s11   ;;  %s487_s10 = sphi %s511_s10, %s553_s10   ;;  %s483_s9 = sphi %s509_s9, %s552_s9  }
   0x3   : > { %p33_p1 = scmp.ge.s32.totalorder %s31_s12, 2  ;;  %p151_p2 = scmp.lt.s32.totalorder %s491_s11, 3 }
   0x5   : > { %s555_s12 = smov (%p33_p1, %s31_s12), 0  ;;  %p152_p3 = pnand %p425_p0, %p151_p2 }
   0x6   : > { %p190_p4 = scmp.lt.s32.totalorder (!%p152_p3), %s483_s9, 1  ;;  %v493_v0 = vmov (!%p152_p3), 0   ;;  %vm229_vm0 = vcmask (!%p152_p3), 1043456   ;;  %v218_v5 = vld [vmem:[%s550_s1] sm:$0xf] (!%p152_p3)  ;;  %vm225_vm1 = vcmask (!%p152_p3), 64512  }
   0x7   : > { %155 = sbr.rel (%p152_p3) target bundleno = 240 (0xf0), region = 28  ;;  %268 = vmatprep.mubr.bf16.mxu0 (!%p152_p3), %v493_v0 }
   0xe   : > { %s557_s9 = smov (!%p190_p4, %s483_s9), 1 }
   0xf   : > { %s436_s13 = sshll.u32 %s557_s9, 3  ;;  %s437_s19 = sshll.u32 %s557_s9, 4 }
  0x10   : > { %s197_s16 = scalar_lea.vmem %s549_s0, %s436_s13  ;;  %s215_s22 = scalar_lea.vmem %s551_s2, %s437_s19 }
  0x11   : > { %v219_v1 = vld [vmem:[%s197_s16] sm:$0xff] }
  0x12   : > { %v431_v2 = vcombine.high %v219_v1, %v219_v1  ;;  %v430_v3 = vcombine.low %v219_v1, %v219_v1  ;;  %v277_v6 = vunpack.c.l.bf16 %v219_v1  ;;  %v278_v7 = vunpack.c.h.bf16 %v219_v1 }
  0x14   : > { %432 = vmatprep.subr.msk.bf16.mxu0 %vm229_vm0, %v431_v2  ;;  %v231_v4 = vsel %vm229_vm0, %v430_v3, 0  ;;  %v279_v8 = vmul.f32 %v277_v6, %v277_v6  ;;  %v280_v9 = vmul.f32 %v278_v7, %v278_v7 }
  0x15   : > { %237 = vmatpush1.bf16.msra.mxu0 %v231_v4 }
  0x16   : > { %v281_v10 = vrot.slane %v279_v8, 4  ;;  %v287_v11 = vrot.slane %v280_v9, 4 }
  0x18   : > { %433 = vmatmul.mubr.msk.bf16.vlgmr.msra.gmra.mrb[0].mxu0 %vm225_vm1, %v218_v5  ;;  %v282_v12 = vadd.f32 %v281_v10, %v279_v8  ;;  %v288_v13 = vadd.f32 %v287_v11, %v280_v9 }
  0x1a   : > { %v283_v14 = vrot.slane %v282_v12, 2  ;;  %v289_v15 = vrot.slane %v288_v13, 2 }
  0x1c   : > { %v284_v16 = vadd.f32 %v283_v14, %v282_v12  ;;  %v290_v17 = vadd.f32 %v289_v15, %v288_v13 }
  0x1e   : > { %v285_v18 = vrot.slane %v284_v16, 1  ;;  %v291_v19 = vrot.slane %v290_v17, 1 }
  0x20   : > { %v286_v20 = vadd.f32 %v285_v18, %v284_v16  ;;  %v292_v21 = vadd.f32 %v291_v19, %v290_v17 }
  0x22   : > { %465 = vrsqrt.f32 %v286_v20 }
  0x23   : > { %467 = vrsqrt.f32 %v292_v21 }
  0x2c   : > { %v466_v22 = vpop.eup %465 }
  0x2d   : > { %v468_v23 = vpop.eup %467 }
  0xeb   : > { %v270_v24 = vpop.f32.mrb[0].mxu0 }
  0xec   : > { %v295_v25 = vmul.f32 %v466_v22, %v270_v24  ;;  %v272_v26 = vpop.f32.mrb[1].mxu0 }
  0xed   : > { %v296_v27 = vmul.f32 %v468_v23, %v272_v26  ;;  %v274_v28 = vpop.f32.mrb[2].mxu0 }
  0xee   : > { %297 = vst [vmem:[%s215_s22] sm:$0xff] %v295_v25  ;;  %v275_v29 = vpop.f32.mrb[3].mxu0 }
  0xef   : > { %298 = vst [vmem:[%s215_s22 + $0x8] sm:$0xff] %v296_v27 }
  0xf0 PF: > { %s12_s11 = sadd.s32 1, %s491_s11   ;;  %s552_s9 = smov %s487_s10 }
  0xf1   : > { %p9_p5 = scmp.ge.s32.totalorder %s12_s11, 4   ;;  %s553_s10 = smov %s555_s12 }
  0xf3   :  { %11 = sbr.rel (!%p9_p5) target bundleno = 2 (0x2), region = 61 }

</bundles_post_ra>
